<compile_context>
chip_gen: v7x
topology: tpu7x:2x2x1
jax: 0.10.0
libtpu: 0.0.40
codegen_flags: <defaults>
</compile_context>

<pallas_src>
import jax
import jax.numpy as jnp
from jax import lax
from jax.experimental import pallas as pl
from jax.experimental.pallas import tpu as pltpu


# ----------------------------------------------------------------------------
# Pallas kernel: full bidirectional-LSTM recurrence for one layer, single
# invocation.  Only the recurrent matmul + gate math is on the sequential path.
#
#   xp_ref : (T, B, 8H)  precomputed input projections, last-dim layout
#            [i_f, i_b, f_f, f_b, g_f, g_b, o_f, o_b]; the *_b blocks are
#            already time-reversed so loop step s reads a single row xp_ref[s].
#   whh_ref: (2H, 8H)    block-diagonal recurrent weight in the same layout.
#   out_ref: (T, B, 2H)  out[t, :, :H] = fwd hidden, out[t, :, H:] = bwd hidden.
# ----------------------------------------------------------------------------
def bilstm_seq_kernel(xp_ref, whh_ref, out_ref):
    T, B, H2 = out_ref.shape          # H2 == 2 * nHidden
    H = H2 // 2
    whh = whh_ref[...]                # resident across the whole loop

    def step(s, carry):
        h, c = carry                  # (B, 2H) fused fwd|bwd state, f32
        gates = xp_ref[s] + jnp.dot(h, whh, preferred_element_type=jnp.float32)
        i = jax.nn.sigmoid(gates[:, 0 * H2:1 * H2])
        f = jax.nn.sigmoid(gates[:, 1 * H2:2 * H2])
        g = jnp.tanh(gates[:, 2 * H2:3 * H2])
        o = jax.nn.sigmoid(gates[:, 3 * H2:4 * H2])
        c_new = f * c + i * g
        h_new = o * jnp.tanh(c_new)
        # forward hidden for timestep s, backward hidden for timestep T-1-s
        out_ref[s, :, 0:H] = h_new[:, 0:H].astype(out_ref.dtype)
        out_ref[T - 1 - s, :, H:H2] = h_new[:, H:H2].astype(out_ref.dtype)
        return h_new, c_new

    h0 = jnp.zeros((B, H2), jnp.float32)
    lax.fori_loop(0, T, step, (h0, h0), unroll=True)


def bilstm_layer(x_seq, lp):
    """One bidirectional LSTM layer (torch nn.LSTM(nIn, H, bidirectional=True)).

    x_seq: (T, B, nIn) -> (T, B, 2H)
    """
    T, B, nIn = x_seq.shape
    H = lp["w_hh_f"].shape[1]

    # ---- hoisted input projection: ONE (T*B, nIn) x (nIn, 8H) GEMM ----------
    w_in = jnp.concatenate([lp["w_ih_f"].T, lp["w_ih_b"].T], axis=1)      # (nIn, 8H)
    b_in = jnp.concatenate([lp["b_ih_f"] + lp["b_hh_f"],
                            lp["b_ih_b"] + lp["b_hh_b"]])                 # (8H,)
    xp = jnp.dot(x_seq.reshape(T * B, nIn), w_in,
                 precision=lax.Precision.HIGHEST) + b_in                  # (T*B, 8H)
    xp = xp.reshape(T, B, 2, 4, H)                                        # [dir, gate, H]
    # interleave gates as [i_f,i_b,f_f,f_b,g_f,g_b,o_f,o_b] and time-reverse
    # the backward half so the kernel reads one contiguous row per step.
    xp_step = jnp.concatenate([xp[:, :, 0], xp[:, :, 1][::-1]], axis=-1)  # (T, B, 4, 2H)
    xp_step = xp_step.reshape(T, B, 8 * H)

    # ---- block-diagonal recurrent weight matching that layout ---------------
    wf = lp["w_hh_f"].T.reshape(H, 4, H)
    wb = lp["w_hh_b"].T.reshape(H, 4, H)
    z = jnp.zeros_like(wf)
    whh_cat = jnp.concatenate([jnp.concatenate([wf, z], axis=-1),
                               jnp.concatenate([z, wb], axis=-1)], axis=0)  # (2H, 4, 2H)
    whh_cat = whh_cat.reshape(2 * H, 8 * H)

    # ---- single kernel invocation, everything VMEM-resident ----------------
    out = pl.pallas_call(
        bilstm_seq_kernel,
        out_shape=jax.ShapeDtypeStruct((T, B, 2 * H), x_seq.dtype),
        in_specs=[pl.BlockSpec(memory_space=pltpu.MemorySpace.VMEM),
                  pl.BlockSpec(memory_space=pltpu.MemorySpace.VMEM)],
        out_specs=pl.BlockSpec(memory_space=pltpu.MemorySpace.VMEM),
    )(xp_step, whh_cat)
    return out


# ----------------------------------------------------------------------------
# Full RNN_Embeddings forward (fc_in / attn / softmax / bmm are single dense
# XLA ops; the sequential LSTM layers use the Pallas kernel above).
# ----------------------------------------------------------------------------
def rnn_embeddings_forward(x, params):
    """x: (B, T, nIn) -> sent_embedding (B, span, 2H) (span != 1 here)."""
    xs = jnp.transpose(x, (1, 0, 2))                                     # (T, B, nIn)
    h = jnp.dot(xs, params["fc_in"]["w"].T,
                precision=lax.Precision.HIGHEST) + params["fc_in"]["b"]  # fc_in
    for lp in params["layers"]:
        h = bilstm_layer(h, lp)                                          # (T, B, 2H)
    h = jnp.transpose(h, (1, 0, 2))                                      # (B, T, 2H)

    # attn_net
    scores = jnp.dot(h, params["attn"]["w"].T,
                     precision=lax.Precision.HIGHEST) + params["attn"]["b"]  # (B, T, span)
    scores = jnp.transpose(scores, (0, 2, 1))                            # (B, span, T)
    # torch F.softmax with no dim on a 3-D tensor normalises over dim 0.
    attn_w = jax.nn.softmax(scores, axis=0)
    sent = jnp.einsum("bst,bth->bsh", attn_w, h,
                      precision=lax.Precision.HIGHEST)                   # torch.bmm
    if sent.shape[1] == 1:                                               # .squeeze(1)
        sent = jnp.squeeze(sent, axis=1)
    return sent


# ----------------------------------------------------------------------------
# Pure-JAX reference (independent formulation, for correctness check only)
# ----------------------------------------------------------------------------
def _lstm_ref_dir(x, w_ih, w_hh, b_ih, b_hh, reverse):
    H = w_hh.shape[1]
    B = x.shape[1]
    xs = x[::-1] if reverse else x

    def step(carry, xt):
        h, c = carry
        gates = (jnp.dot(xt, w_ih.T, precision=lax.Precision.HIGHEST) + b_ih
                 + jnp.dot(h, w_hh.T, precision=lax.Precision.HIGHEST) + b_hh)
        i = jax.nn.sigmoid(gates[:, 0 * H:1 * H])
        f = jax.nn.sigmoid(gates[:, 1 * H:2 * H])
        g = jnp.tanh(gates[:, 2 * H:3 * H])
        o = jax.nn.sigmoid(gates[:, 3 * H:4 * H])
        c_new = f * c + i * g
        h_new = o * jnp.tanh(c_new)
        return (h_new, c_new), h_new

    h0 = jnp.zeros((B, H), jnp.float32)
    _, hs = lax.scan(step, (h0, h0), xs)
    return hs[::-1] if reverse else hs


def rnn_embeddings_reference(x, params):
    xs = jnp.transpose(x, (1, 0, 2))
    h = jnp.dot(xs, params["fc_in"]["w"].T,
                precision=lax.Precision.HIGHEST) + params["fc_in"]["b"]
    for lp in params["layers"]:
        fwd = _lstm_ref_dir(h, lp["w_ih_f"], lp["w_hh_f"], lp["b_ih_f"], lp["b_hh_f"], False)
        bwd = _lstm_ref_dir(h, lp["w_ih_b"], lp["w_hh_b"], lp["b_ih_b"], lp["b_hh_b"], True)
        h = jnp.concatenate([fwd, bwd], axis=-1)
    h = jnp.transpose(h, (1, 0, 2))
    scores = jnp.dot(h, params["attn"]["w"].T,
                     precision=lax.Precision.HIGHEST) + params["attn"]["b"]
    scores = jnp.transpose(scores, (0, 2, 1))
    attn_w = jax.nn.softmax(scores, axis=0)
    sent = jnp.einsum("bst,bth->bsh", attn_w, h, precision=lax.Precision.HIGHEST)
    if sent.shape[1] == 1:
        sent = jnp.squeeze(sent, axis=1)
    return sent


# ----------------------------------------------------------------------------
# Deterministic parameter init (torch-style shapes and uniform bounds)
# ----------------------------------------------------------------------------
def init_params(key, nIn, nHidden, depth, span):
    H = nHidden
    n_keys = 4 + 8 * depth
    keys = jax.random.split(key, n_keys)
    ki = iter(range(n_keys))

    def u(shape, bound):
        return jax.random.uniform(keys[next(ki)], shape, jnp.float32, -bound, bound)

    b_fc = 1.0 / float(nIn) ** 0.5
    fc_in = {"w": u((2 * H, nIn), b_fc), "b": u((2 * H,), b_fc)}

    b_l = 1.0 / float(H) ** 0.5
    layers = []
    for _ in range(depth):
        layers.append({
            "w_ih_f": u((4 * H, 2 * H), b_l), "w_hh_f": u((4 * H, H), b_l),
            "b_ih_f": u((4 * H,), b_l),       "b_hh_f": u((4 * H,), b_l),
            "w_ih_b": u((4 * H, 2 * H), b_l), "w_hh_b": u((4 * H, H), b_l),
            "b_ih_b": u((4 * H,), b_l),       "b_hh_b": u((4 * H,), b_l),
        })

    b_a = 1.0 / float(2 * H) ** 0.5
    attn = {"w": u((span, 2 * H), b_a), "b": u((span,), b_a)}
    return {"fc_in": fc_in, "layers": layers, "attn": attn}


if __name__ == "__main__":
    B, T, nIn, nHidden, depth, span = 2, 8, 16, 32, 2, 4

    key = jax.random.PRNGKey(0)
    kx, kp = jax.random.split(key)
    x = jax.random.normal(kx, (B, T, nIn), jnp.float32)
    params = init_params(kp, nIn, nHidden, depth, span)

    out = jax.block_until_ready(rnn_embeddings_forward(x, params))
    assert out.shape == (B, span, 2 * nHidden), out.shape

    ref = jax.block_until_ready(rnn_embeddings_reference(x, params))
    max_err = float(jnp.max(jnp.abs(out - ref)))
    assert jnp.allclose(out, ref, atol=2e-3, rtol=2e-3), max_err

    print("KERNEL_OK")
</pallas_src>

<mosaic_0001>
module attributes {stable_mosaic.version = 11 : i64} {
  func.func @bilstm_seq_kernel(%arg0: memref<8x2x256xf32, #tpu.memory_space<vmem>>, %arg1: memref<64x256xf32, #tpu.memory_space<vmem>>, %arg2: memref<8x2x64xf32, #tpu.memory_space<vmem>>) attributes {dimension_semantics = [], scalar_prefetch = 0 : i64, scratch_operands = 0 : i64, tpu.core_type = #tpu.core_type<tc>} {
    %c0 = arith.constant 0 : index
    %c0_0 = arith.constant 0 : index
    %0 = vector.load %arg1[%c0, %c0_0] : memref<64x256xf32, #tpu.memory_space<vmem>>, vector<64x256xf32>
    %cst = arith.constant 0.000000e+00 : f32
    %1 = vector.broadcast %cst : f32 to vector<2x64xf32>
    %c0_i32 = arith.constant 0 : i32
    %2 = arith.index_cast %c0_i32 : i32 to index
    %c0_1 = arith.constant 0 : index
    %c0_2 = arith.constant 0 : index
    %3 = vector.load %arg0[%2, %c0_1, %c0_2] : memref<8x2x256xf32, #tpu.memory_space<vmem>>, vector<1x2x256xf32>
    %4 = vector.shape_cast %3 : vector<1x2x256xf32> to vector<2x256xf32>
    %cst_3 = arith.constant dense<0.000000e+00> : vector<2x256xf32>
    %5 = tpu.matmul %1, %0, %cst_3 {dimension_numbers = #tpu.dot_dimension_numbers<[1], [0], [0], [1], [0, 0, 1, 1], [], []>} : vector<2x64xf32>, vector<64x256xf32>, vector<2x256xf32> -> vector<2x256xf32>
    %6 = arith.addf %4, %5 : vector<2x256xf32>
    %7 = vector.extract_strided_slice %6 {offsets = [0, 0], sizes = [2, 64], strides = [1, 1]} : vector<2x256xf32> to vector<2x64xf32>
    %8 = arith.negf %7 : vector<2x64xf32>
    %9 = math.exp %8 : vector<2x64xf32>
    %cst_4 = arith.constant 1.000000e+00 : f32
    %10 = vector.broadcast %cst_4 : f32 to vector<2x64xf32>
    %11 = arith.addf %10, %9 : vector<2x64xf32>
    %12 = arith.divf %10, %11 : vector<2x64xf32>
    %13 = vector.extract_strided_slice %6 {offsets = [0, 64], sizes = [2, 64], strides = [1, 1]} : vector<2x256xf32> to vector<2x64xf32>
    %14 = arith.negf %13 : vector<2x64xf32>
    %15 = math.exp %14 : vector<2x64xf32>
    %cst_5 = arith.constant 1.000000e+00 : f32
    %16 = vector.broadcast %cst_5 : f32 to vector<2x64xf32>
    %17 = arith.addf %16, %15 : vector<2x64xf32>
    %18 = arith.divf %16, %17 : vector<2x64xf32>
    %19 = vector.extract_strided_slice %6 {offsets = [0, 128], sizes = [2, 64], strides = [1, 1]} : vector<2x256xf32> to vector<2x64xf32>
    %20 = math.tanh %19 : vector<2x64xf32>
    %21 = vector.extract_strided_slice %6 {offsets = [0, 192], sizes = [2, 64], strides = [1, 1]} : vector<2x256xf32> to vector<2x64xf32>
    %22 = arith.negf %21 : vector<2x64xf32>
    %23 = math.exp %22 : vector<2x64xf32>
    %cst_6 = arith.constant 1.000000e+00 : f32
    %24 = vector.broadcast %cst_6 : f32 to vector<2x64xf32>
    %25 = arith.addf %24, %23 : vector<2x64xf32>
    %26 = arith.divf %24, %25 : vector<2x64xf32>
    %27 = arith.mulf %18, %1 : vector<2x64xf32>
    %28 = arith.mulf %12, %20 : vector<2x64xf32>
    %29 = arith.addf %27, %28 : vector<2x64xf32>
    %30 = math.tanh %29 : vector<2x64xf32>
    %31 = arith.mulf %26, %30 : vector<2x64xf32>
    %32 = vector.extract_strided_slice %31 {offsets = [0, 0], sizes = [2, 32], strides = [1, 1]} : vector<2x64xf32> to vector<2x32xf32>
    %33 = arith.index_cast %c0_i32 : i32 to index
    %c0_7 = arith.constant 0 : index
    %c0_8 = arith.constant 0 : index
    %34 = vector.load %arg2[%33, %c0_7, %c0_8] : memref<8x2x64xf32, #tpu.memory_space<vmem>>, vector<1x2x32xf32>
    %35 = vector.shape_cast %34 : vector<1x2x32xf32> to vector<2x32xf32>
    %36 = vector.shape_cast %32 : vector<2x32xf32> to vector<1x2x32xf32>
    tpu.vector_store %arg2[%33, %c0_7, %c0_8], %36 {strides = array<i32>} : memref<8x2x64xf32, #tpu.memory_space<vmem>>, vector<1x2x32xf32>,
    %37 = vector.extract_strided_slice %31 {offsets = [0, 32], sizes = [2, 32], strides = [1, 1]} : vector<2x64xf32> to vector<2x32xf32>
    %c7_i32 = arith.constant 7 : i32
    %38 = arith.subi %c7_i32, %c0_i32 : i32
    %39 = arith.index_cast %38 : i32 to index
    %c0_9 = arith.constant 0 : index
    %c32 = arith.constant 32 : index
    %40 = vector.load %arg2[%39, %c0_9, %c32] : memref<8x2x64xf32, #tpu.memory_space<vmem>>, vector<1x2x32xf32>
    %41 = vector.shape_cast %40 : vector<1x2x32xf32> to vector<2x32xf32>
    %42 = vector.shape_cast %37 : vector<2x32xf32> to vector<1x2x32xf32>
    tpu.vector_store %arg2[%39, %c0_9, %c32], %42 {strides = array<i32>} : memref<8x2x64xf32, #tpu.memory_space<vmem>>, vector<1x2x32xf32>,
    %c1_i32 = arith.constant 1 : i32
    %43 = arith.index_cast %c1_i32 : i32 to index
    %c0_10 = arith.constant 0 : index
    %c0_11 = arith.constant 0 : index
    %44 = vector.load %arg0[%43, %c0_10, %c0_11] : memref<8x2x256xf32, #tpu.memory_space<vmem>>, vector<1x2x256xf32>
    %45 = vector.shape_cast %44 : vector<1x2x256xf32> to vector<2x256xf32>
    %cst_12 = arith.constant dense<0.000000e+00> : vector<2x256xf32>
    %46 = tpu.matmul %31, %0, %cst_12 {dimension_numbers = #tpu.dot_dimension_numbers<[1], [0], [0], [1], [0, 0, 1, 1], [], []>} : vector<2x64xf32>, vector<64x256xf32>, vector<2x256xf32> -> vector<2x256xf32>
    %47 = arith.addf %45, %46 : vector<2x256xf32>
    %48 = vector.extract_strided_slice %47 {offsets = [0, 0], sizes = [2, 64], strides = [1, 1]} : vector<2x256xf32> to vector<2x64xf32>
    %49 = arith.negf %48 : vector<2x64xf32>
    %50 = math.exp %49 : vector<2x64xf32>
    %cst_13 = arith.constant 1.000000e+00 : f32
    %51 = vector.broadcast %cst_13 : f32 to vector<2x64xf32>
    %52 = arith.addf %51, %50 : vector<2x64xf32>
    %53 = arith.divf %51, %52 : vector<2x64xf32>
    %54 = vector.extract_strided_slice %47 {offsets = [0, 64], sizes = [2, 64], strides = [1, 1]} : vector<2x256xf32> to vector<2x64xf32>
    %55 = arith.negf %54 : vector<2x64xf32>
    %56 = math.exp %55 : vector<2x64xf32>
    %cst_14 = arith.constant 1.000000e+00 : f32
    %57 = vector.broadcast %cst_14 : f32 to vector<2x64xf32>
    %58 = arith.addf %57, %56 : vector<2x64xf32>
    %59 = arith.divf %57, %58 : vector<2x64xf32>
    %60 = vector.extract_strided_slice %47 {offsets = [0, 128], sizes = [2, 64], strides = [1, 1]} : vector<2x256xf32> to vector<2x64xf32>
    %61 = math.tanh %60 : vector<2x64xf32>
    %62 = vector.extract_strided_slice %47 {offsets = [0, 192], sizes = [2, 64], strides = [1, 1]} : vector<2x256xf32> to vector<2x64xf32>
    %63 = arith.negf %62 : vector<2x64xf32>
    %64 = math.exp %63 : vector<2x64xf32>
    %cst_15 = arith.constant 1.000000e+00 : f32
    %65 = vector.broadcast %cst_15 : f32 to vector<2x64xf32>
    %66 = arith.addf %65, %64 : vector<2x64xf32>
    %67 = arith.divf %65, %66 : vector<2x64xf32>
    %68 = arith.mulf %59, %29 : vector<2x64xf32>
    %69 = arith.mulf %53, %61 : vector<2x64xf32>
    %70 = arith.addf %68, %69 : vector<2x64xf32>
    %71 = math.tanh %70 : vector<2x64xf32>
    %72 = arith.mulf %67, %71 : vector<2x64xf32>
    %73 = vector.extract_strided_slice %72 {offsets = [0, 0], sizes = [2, 32], strides = [1, 1]} : vector<2x64xf32> to vector<2x32xf32>
    %74 = arith.index_cast %c1_i32 : i32 to index
    %c0_16 = arith.constant 0 : index
    %c0_17 = arith.constant 0 : index
    %75 = vector.load %arg2[%74, %c0_16, %c0_17] : memref<8x2x64xf32, #tpu.memory_space<vmem>>, vector<1x2x32xf32>
    %76 = vector.shape_cast %75 : vector<1x2x32xf32> to vector<2x32xf32>
    %77 = vector.shape_cast %73 : vector<2x32xf32> to vector<1x2x32xf32>
    tpu.vector_store %arg2[%74, %c0_16, %c0_17], %77 {strides = array<i32>} : memref<8x2x64xf32, #tpu.memory_space<vmem>>, vector<1x2x32xf32>,
    %78 = vector.extract_strided_slice %72 {offsets = [0, 32], sizes = [2, 32], strides = [1, 1]} : vector<2x64xf32> to vector<2x32xf32>
    %c7_i32_18 = arith.constant 7 : i32
    %79 = arith.subi %c7_i32_18, %c1_i32 : i32
    %80 = arith.index_cast %79 : i32 to index
    %c0_19 = arith.constant 0 : index
    %c32_20 = arith.constant 32 : index
    %81 = vector.load %arg2[%80, %c0_19, %c32_20] : memref<8x2x64xf32, #tpu.memory_space<vmem>>, vector<1x2x32xf32>
    %82 = vector.shape_cast %81 : vector<1x2x32xf32> to vector<2x32xf32>
    %83 = vector.shape_cast %78 : vector<2x32xf32> to vector<1x2x32xf32>
    tpu.vector_store %arg2[%80, %c0_19, %c32_20], %83 {strides = array<i32>} : memref<8x2x64xf32, #tpu.memory_space<vmem>>, vector<1x2x32xf32>,
    %c2_i32 = arith.constant 2 : i32
    %84 = arith.index_cast %c2_i32 : i32 to index
    %c0_21 = arith.constant 0 : index
    %c0_22 = arith.constant 0 : index
    %85 = vector.load %arg0[%84, %c0_21, %c0_22] : memref<8x2x256xf32, #tpu.memory_space<vmem>>, vector<1x2x256xf32>
    %86 = vector.shape_cast %85 : vector<1x2x256xf32> to vector<2x256xf32>
    %cst_23 = arith.constant dense<0.000000e+00> : vector<2x256xf32>
    %87 = tpu.matmul %72, %0, %cst_23 {dimension_numbers = #tpu.dot_dimension_numbers<[1], [0], [0], [1], [0, 0, 1, 1], [], []>} : vector<2x64xf32>, vector<64x256xf32>, vector<2x256xf32> -> vector<2x256xf32>
    %88 = arith.addf %86, %87 : vector<2x256xf32>
    %89 = vector.extract_strided_slice %88 {offsets = [0, 0], sizes = [2, 64], strides = [1, 1]} : vector<2x256xf32> to vector<2x64xf32>
    %90 = arith.negf %89 : vector<2x64xf32>
    %91 = math.exp %90 : vector<2x64xf32>
    %cst_24 = arith.constant 1.000000e+00 : f32
    %92 = vector.broadcast %cst_24 : f32 to vector<2x64xf32>
    %93 = arith.addf %92, %91 : vector<2x64xf32>
    %94 = arith.divf %92, %93 : vector<2x64xf32>
    %95 = vector.extract_strided_slice %88 {offsets = [0, 64], sizes = [2, 64], strides = [1, 1]} : vector<2x256xf32> to vector<2x64xf32>
    %96 = arith.negf %95 : vector<2x64xf32>
    %97 = math.exp %96 : vector<2x64xf32>
    %cst_25 = arith.constant 1.000000e+00 : f32
    %98 = vector.broadcast %cst_25 : f32 to vector<2x64xf32>
    %99 = arith.addf %98, %97 : vector<2x64xf32>
    %100 = arith.divf %98, %99 : vector<2x64xf32>
    %101 = vector.extract_strided_slice %88 {offsets = [0, 128], sizes = [2, 64], strides = [1, 1]} : vector<2x256xf32> to vector<2x64xf32>
    %102 = math.tanh %101 : vector<2x64xf32>
    %103 = vector.extract_strided_slice %88 {offsets = [0, 192], sizes = [2, 64], strides = [1, 1]} : vector<2x256xf32> to vector<2x64xf32>
    %104 = arith.negf %103 : vector<2x64xf32>
    %105 = math.exp %104 : vector<2x64xf32>
    %cst_26 = arith.constant 1.000000e+00 : f32
    %106 = vector.broadcast %cst_26 : f32 to vector<2x64xf32>
    %107 = arith.addf %106, %105 : vector<2x64xf32>
    %108 = arith.divf %106, %107 : vector<2x64xf32>
    %109 = arith.mulf %100, %70 : vector<2x64xf32>
    %110 = arith.mulf %94, %102 : vector<2x64xf32>
    %111 = arith.addf %109, %110 : vector<2x64xf32>
    %112 = math.tanh %111 : vector<2x64xf32>
    %113 = arith.mulf %108, %112 : vector<2x64xf32>
    %114 = vector.extract_strided_slice %113 {offsets = [0, 0], sizes = [2, 32], strides = [1, 1]} : vector<2x64xf32> to vector<2x32xf32>
    %115 = arith.index_cast %c2_i32 : i32 to index
    %c0_27 = arith.constant 0 : index
    %c0_28 = arith.constant 0 : index
    %116 = vector.load %arg2[%115, %c0_27, %c0_28] : memref<8x2x64xf32, #tpu.memory_space<vmem>>, vector<1x2x32xf32>
    %117 = vector.shape_cast %116 : vector<1x2x32xf32> to vector<2x32xf32>
    %118 = vector.shape_cast %114 : vector<2x32xf32> to vector<1x2x32xf32>
    tpu.vector_store %arg2[%115, %c0_27, %c0_28], %118 {strides = array<i32>} : memref<8x2x64xf32, #tpu.memory_space<vmem>>, vector<1x2x32xf32>,
    %119 = vector.extract_strided_slice %113 {offsets = [0, 32], sizes = [2, 32], strides = [1, 1]} : vector<2x64xf32> to vector<2x32xf32>
    %c7_i32_29 = arith.constant 7 : i32
    %120 = arith.subi %c7_i32_29, %c2_i32 : i32
    %121 = arith.index_cast %120 : i32 to index
    %c0_30 = arith.constant 0 : index
    %c32_31 = arith.constant 32 : index
    %122 = vector.load %arg2[%121, %c0_30, %c32_31] : memref<8x2x64xf32, #tpu.memory_space<vmem>>, vector<1x2x32xf32>
    %123 = vector.shape_cast %122 : vector<1x2x32xf32> to vector<2x32xf32>
    %124 = vector.shape_cast %119 : vector<2x32xf32> to vector<1x2x32xf32>
    tpu.vector_store %arg2[%121, %c0_30, %c32_31], %124 {strides = array<i32>} : memref<8x2x64xf32, #tpu.memory_space<vmem>>, vector<1x2x32xf32>,
    %c3_i32 = arith.constant 3 : i32
    %125 = arith.index_cast %c3_i32 : i32 to index
    %c0_32 = arith.constant 0 : index
    %c0_33 = arith.constant 0 : index
    %126 = vector.load %arg0[%125, %c0_32, %c0_33] : memref<8x2x256xf32, #tpu.memory_space<vmem>>, vector<1x2x256xf32>
    %127 = vector.shape_cast %126 : vector<1x2x256xf32> to vector<2x256xf32>
    %cst_34 = arith.constant dense<0.000000e+00> : vector<2x256xf32>
    %128 = tpu.matmul %113, %0, %cst_34 {dimension_numbers = #tpu.dot_dimension_numbers<[1], [0], [0], [1], [0, 0, 1, 1], [], []>} : vector<2x64xf32>, vector<64x256xf32>, vector<2x256xf32> -> vector<2x256xf32>
    %129 = arith.addf %127, %128 : vector<2x256xf32>
    %130 = vector.extract_strided_slice %129 {offsets = [0, 0], sizes = [2, 64], strides = [1, 1]} : vector<2x256xf32> to vector<2x64xf32>
    %131 = arith.negf %130 : vector<2x64xf32>
    %132 = math.exp %131 : vector<2x64xf32>
    %cst_35 = arith.constant 1.000000e+00 : f32
    %133 = vector.broadcast %cst_35 : f32 to vector<2x64xf32>
    %134 = arith.addf %133, %132 : vector<2x64xf32>
    %135 = arith.divf %133, %134 : vector<2x64xf32>
    %136 = vector.extract_strided_slice %129 {offsets = [0, 64], sizes = [2, 64], strides = [1, 1]} : vector<2x256xf32> to vector<2x64xf32>
    %137 = arith.negf %136 : vector<2x64xf32>
    %138 = math.exp %137 : vector<2x64xf32>
    %cst_36 = arith.constant 1.000000e+00 : f32
    %139 = vector.broadcast %cst_36 : f32 to vector<2x64xf32>
    %140 = arith.addf %139, %138 : vector<2x64xf32>
    %141 = arith.divf %139, %140 : vector<2x64xf32>
    %142 = vector.extract_strided_slice %129 {offsets = [0, 128], sizes = [2, 64], strides = [1, 1]} : vector<2x256xf32> to vector<2x64xf32>
    %143 = math.tanh %142 : vector<2x64xf32>
    %144 = vector.extract_strided_slice %129 {offsets = [0, 192], sizes = [2, 64], strides = [1, 1]} : vector<2x256xf32> to vector<2x64xf32>
    %145 = arith.negf %144 : vector<2x64xf32>
    %146 = math.exp %145 : vector<2x64xf32>
    %cst_37 = arith.constant 1.000000e+00 : f32
    %147 = vector.broadcast %cst_37 : f32 to vector<2x64xf32>
    %148 = arith.addf %147, %146 : vector<2x64xf32>
    %149 = arith.divf %147, %148 : vector<2x64xf32>
    %150 = arith.mulf %141, %111 : vector<2x64xf32>
    %151 = arith.mulf %135, %143 : vector<2x64xf32>
    %152 = arith.addf %150, %151 : vector<2x64xf32>
    %153 = math.tanh %152 : vector<2x64xf32>
    %154 = arith.mulf %149, %153 : vector<2x64xf32>
    %155 = vector.extract_strided_slice %154 {offsets = [0, 0], sizes = [2, 32], strides = [1, 1]} : vector<2x64xf32> to vector<2x32xf32>
    %156 = arith.index_cast %c3_i32 : i32 to index
    %c0_38 = arith.constant 0 : index
    %c0_39 = arith.constant 0 : index
    %157 = vector.load %arg2[%156, %c0_38, %c0_39] : memref<8x2x64xf32, #tpu.memory_space<vmem>>, vector<1x2x32xf32>
    %158 = vector.shape_cast %157 : vector<1x2x32xf32> to vector<2x32xf32>
    %159 = vector.shape_cast %155 : vector<2x32xf32> to vector<1x2x32xf32>
    tpu.vector_store %arg2[%156, %c0_38, %c0_39], %159 {strides = array<i32>} : memref<8x2x64xf32, #tpu.memory_space<vmem>>, vector<1x2x32xf32>,
    %160 = vector.extract_strided_slice %154 {offsets = [0, 32], sizes = [2, 32], strides = [1, 1]} : vector<2x64xf32> to vector<2x32xf32>
    %c7_i32_40 = arith.constant 7 : i32
    %161 = arith.subi %c7_i32_40, %c3_i32 : i32
    %162 = arith.index_cast %161 : i32 to index
    %c0_41 = arith.constant 0 : index
    %c32_42 = arith.constant 32 : index
    %163 = vector.load %arg2[%162, %c0_41, %c32_42] : memref<8x2x64xf32, #tpu.memory_space<vmem>>, vector<1x2x32xf32>
    %164 = vector.shape_cast %163 : vector<1x2x32xf32> to vector<2x32xf32>
    %165 = vector.shape_cast %160 : vector<2x32xf32> to vector<1x2x32xf32>
    tpu.vector_store %arg2[%162, %c0_41, %c32_42], %165 {strides = array<i32>} : memref<8x2x64xf32, #tpu.memory_space<vmem>>, vector<1x2x32xf32>,
    %c4_i32 = arith.constant 4 : i32
    %166 = arith.index_cast %c4_i32 : i32 to index
    %c0_43 = arith.constant 0 : index
    %c0_44 = arith.constant 0 : index
    %167 = vector.load %arg0[%166, %c0_43, %c0_44] : memref<8x2x256xf32, #tpu.memory_space<vmem>>, vector<1x2x256xf32>
    %168 = vector.shape_cast %167 : vector<1x2x256xf32> to vector<2x256xf32>
    %cst_45 = arith.constant dense<0.000000e+00> : vector<2x256xf32>
    %169 = tpu.matmul %154, %0, %cst_45 {dimension_numbers = #tpu.dot_dimension_numbers<[1], [0], [0], [1], [0, 0, 1, 1], [], []>} : vector<2x64xf32>, vector<64x256xf32>, vector<2x256xf32> -> vector<2x256xf32>
    %170 = arith.addf %168, %169 : vector<2x256xf32>
    %171 = vector.extract_strided_slice %170 {offsets = [0, 0], sizes = [2, 64], strides = [1, 1]} : vector<2x256xf32> to vector<2x64xf32>
    %172 = arith.negf %171 : vector<2x64xf32>
    %173 = math.exp %172 : vector<2x64xf32>
    %cst_46 = arith.constant 1.000000e+00 : f32
    %174 = vector.broadcast %cst_46 : f32 to vector<2x64xf32>
    %175 = arith.addf %174, %173 : vector<2x64xf32>
    %176 = arith.divf %174, %175 : vector<2x64xf32>
    %177 = vector.extract_strided_slice %170 {offsets = [0, 64], sizes = [2, 64], strides = [1, 1]} : vector<2x256xf32> to vector<2x64xf32>
    %178 = arith.negf %177 : vector<2x64xf32>
    %179 = math.exp %178 : vector<2x64xf32>
    %cst_47 = arith.constant 1.000000e+00 : f32
    %180 = vector.broadcast %cst_47 : f32 to vector<2x64xf32>
    %181 = arith.addf %180, %179 : vector<2x64xf32>
    %182 = arith.divf %180, %181 : vector<2x64xf32>
    %183 = vector.extract_strided_slice %170 {offsets = [0, 128], sizes = [2, 64], strides = [1, 1]} : vector<2x256xf32> to vector<2x64xf32>
    %184 = math.tanh %183 : vector<2x64xf32>
    %185 = vector.extract_strided_slice %170 {offsets = [0, 192], sizes = [2, 64], strides = [1, 1]} : vector<2x256xf32> to vector<2x64xf32>
    %186 = arith.negf %185 : vector<2x64xf32>
    %187 = math.exp %186 : vector<2x64xf32>
    %cst_48 = arith.constant 1.000000e+00 : f32
    %188 = vector.broadcast %cst_48 : f32 to vector<2x64xf32>
    %189 = arith.addf %188, %187 : vector<2x64xf32>
    %190 = arith.divf %188, %189 : vector<2x64xf32>
    %191 = arith.mulf %182, %152 : vector<2x64xf32>
    %192 = arith.mulf %176, %184 : vector<2x64xf32>
    %193 = arith.addf %191, %192 : vector<2x64xf32>
    %194 = math.tanh %193 : vector<2x64xf32>
    %195 = arith.mulf %190, %194 : vector<2x64xf32>
    %196 = vector.extract_strided_slice %195 {offsets = [0, 0], sizes = [2, 32], strides = [1, 1]} : vector<2x64xf32> to vector<2x32xf32>
    %197 = arith.index_cast %c4_i32 : i32 to index
    %c0_49 = arith.constant 0 : index
    %c0_50 = arith.constant 0 : index
    %198 = vector.load %arg2[%197, %c0_49, %c0_50] : memref<8x2x64xf32, #tpu.memory_space<vmem>>, vector<1x2x32xf32>
    %199 = vector.shape_cast %198 : vector<1x2x32xf32> to vector<2x32xf32>
    %200 = vector.shape_cast %196 : vector<2x32xf32> to vector<1x2x32xf32>
    tpu.vector_store %arg2[%197, %c0_49, %c0_50], %200 {strides = array<i32>} : memref<8x2x64xf32, #tpu.memory_space<vmem>>, vector<1x2x32xf32>,
    %201 = vector.extract_strided_slice %195 {offsets = [0, 32], sizes = [2, 32], strides = [1, 1]} : vector<2x64xf32> to vector<2x32xf32>
    %c7_i32_51 = arith.constant 7 : i32
    %202 = arith.subi %c7_i32_51, %c4_i32 : i32
    %203 = arith.index_cast %202 : i32 to index
    %c0_52 = arith.constant 0 : index
    %c32_53 = arith.constant 32 : index
    %204 = vector.load %arg2[%203, %c0_52, %c32_53] : memref<8x2x64xf32, #tpu.memory_space<vmem>>, vector<1x2x32xf32>
    %205 = vector.shape_cast %204 : vector<1x2x32xf32> to vector<2x32xf32>
    %206 = vector.shape_cast %201 : vector<2x32xf32> to vector<1x2x32xf32>
    tpu.vector_store %arg2[%203, %c0_52, %c32_53], %206 {strides = array<i32>} : memref<8x2x64xf32, #tpu.memory_space<vmem>>, vector<1x2x32xf32>,
    %c5_i32 = arith.constant 5 : i32
    %207 = arith.index_cast %c5_i32 : i32 to index
    %c0_54 = arith.constant 0 : index
    %c0_55 = arith.constant 0 : index
    %208 = vector.load %arg0[%207, %c0_54, %c0_55] : memref<8x2x256xf32, #tpu.memory_space<vmem>>, vector<1x2x256xf32>
    %209 = vector.shape_cast %208 : vector<1x2x256xf32> to vector<2x256xf32>
    %cst_56 = arith.constant dense<0.000000e+00> : vector<2x256xf32>
    %210 = tpu.matmul %195, %0, %cst_56 {dimension_numbers = #tpu.dot_dimension_numbers<[1], [0], [0], [1], [0, 0, 1, 1], [], []>} : vector<2x64xf32>, vector<64x256xf32>, vector<2x256xf32> -> vector<2x256xf32>
    %211 = arith.addf %209, %210 : vector<2x256xf32>
    %212 = vector.extract_strided_slice %211 {offsets = [0, 0], sizes = [2, 64], strides = [1, 1]} : vector<2x256xf32> to vector<2x64xf32>
    %213 = arith.negf %212 : vector<2x64xf32>
    %214 = math.exp %213 : vector<2x64xf32>
    %cst_57 = arith.constant 1.000000e+00 : f32
    %215 = vector.broadcast %cst_57 : f32 to vector<2x64xf32>
    %216 = arith.addf %215, %214 : vector<2x64xf32>
    %217 = arith.divf %215, %216 : vector<2x64xf32>
    %218 = vector.extract_strided_slice %211 {offsets = [0, 64], sizes = [2, 64], strides = [1, 1]} : vector<2x256xf32> to vector<2x64xf32>
    %219 = arith.negf %218 : vector<2x64xf32>
    %220 = math.exp %219 : vector<2x64xf32>
    %cst_58 = arith.constant 1.000000e+00 : f32
    %221 = vector.broadcast %cst_58 : f32 to vector<2x64xf32>
    %222 = arith.addf %221, %220 : vector<2x64xf32>
    %223 = arith.divf %221, %222 : vector<2x64xf32>
    %224 = vector.extract_strided_slice %211 {offsets = [0, 128], sizes = [2, 64], strides = [1, 1]} : vector<2x256xf32> to vector<2x64xf32>
    %225 = math.tanh %224 : vector<2x64xf32>
    %226 = vector.extract_strided_slice %211 {offsets = [0, 192], sizes = [2, 64], strides = [1, 1]} : vector<2x256xf32> to vector<2x64xf32>
    %227 = arith.negf %226 : vector<2x64xf32>
    %228 = math.exp %227 : vector<2x64xf32>
    %cst_59 = arith.constant 1.000000e+00 : f32
    %229 = vector.broadcast %cst_59 : f32 to vector<2x64xf32>
    %230 = arith.addf %229, %228 : vector<2x64xf32>
    %231 = arith.divf %229, %230 : vector<2x64xf32>
    %232 = arith.mulf %223, %193 : vector<2x64xf32>
    %233 = arith.mulf %217, %225 : vector<2x64xf32>
    %234 = arith.addf %232, %233 : vector<2x64xf32>
    %235 = math.tanh %234 : vector<2x64xf32>
    %236 = arith.mulf %231, %235 : vector<2x64xf32>
    %237 = vector.extract_strided_slice %236 {offsets = [0, 0], sizes = [2, 32], strides = [1, 1]} : vector<2x64xf32> to vector<2x32xf32>
    %238 = arith.index_cast %c5_i32 : i32 to index
    %c0_60 = arith.constant 0 : index
    %c0_61 = arith.constant 0 : index
    %239 = vector.load %arg2[%238, %c0_60, %c0_61] : memref<8x2x64xf32, #tpu.memory_space<vmem>>, vector<1x2x32xf32>
    %240 = vector.shape_cast %239 : vector<1x2x32xf32> to vector<2x32xf32>
    %241 = vector.shape_cast %237 : vector<2x32xf32> to vector<1x2x32xf32>
    tpu.vector_store %arg2[%238, %c0_60, %c0_61], %241 {strides = array<i32>} : memref<8x2x64xf32, #tpu.memory_space<vmem>>, vector<1x2x32xf32>,
    %242 = vector.extract_strided_slice %236 {offsets = [0, 32], sizes = [2, 32], strides = [1, 1]} : vector<2x64xf32> to vector<2x32xf32>
    %c7_i32_62 = arith.constant 7 : i32
    %243 = arith.subi %c7_i32_62, %c5_i32 : i32
    %244 = arith.index_cast %243 : i32 to index
    %c0_63 = arith.constant 0 : index
    %c32_64 = arith.constant 32 : index
    %245 = vector.load %arg2[%244, %c0_63, %c32_64] : memref<8x2x64xf32, #tpu.memory_space<vmem>>, vector<1x2x32xf32>
    %246 = vector.shape_cast %245 : vector<1x2x32xf32> to vector<2x32xf32>
    %247 = vector.shape_cast %242 : vector<2x32xf32> to vector<1x2x32xf32>
    tpu.vector_store %arg2[%244, %c0_63, %c32_64], %247 {strides = array<i32>} : memref<8x2x64xf32, #tpu.memory_space<vmem>>, vector<1x2x32xf32>,
    %c6_i32 = arith.constant 6 : i32
    %248 = arith.index_cast %c6_i32 : i32 to index
    %c0_65 = arith.constant 0 : index
    %c0_66 = arith.constant 0 : index
    %249 = vector.load %arg0[%248, %c0_65, %c0_66] : memref<8x2x256xf32, #tpu.memory_space<vmem>>, vector<1x2x256xf32>
    %250 = vector.shape_cast %249 : vector<1x2x256xf32> to vector<2x256xf32>
    %cst_67 = arith.constant dense<0.000000e+00> : vector<2x256xf32>
    %251 = tpu.matmul %236, %0, %cst_67 {dimension_numbers = #tpu.dot_dimension_numbers<[1], [0], [0], [1], [0, 0, 1, 1], [], []>} : vector<2x64xf32>, vector<64x256xf32>, vector<2x256xf32> -> vector<2x256xf32>
    %252 = arith.addf %250, %251 : vector<2x256xf32>
    %253 = vector.extract_strided_slice %252 {offsets = [0, 0], sizes = [2, 64], strides = [1, 1]} : vector<2x256xf32> to vector<2x64xf32>
    %254 = arith.negf %253 : vector<2x64xf32>
    %255 = math.exp %254 : vector<2x64xf32>
    %cst_68 = arith.constant 1.000000e+00 : f32
    %256 = vector.broadcast %cst_68 : f32 to vector<2x64xf32>
    %257 = arith.addf %256, %255 : vector<2x64xf32>
    %258 = arith.divf %256, %257 : vector<2x64xf32>
    %259 = vector.extract_strided_slice %252 {offsets = [0, 64], sizes = [2, 64], strides = [1, 1]} : vector<2x256xf32> to vector<2x64xf32>
    %260 = arith.negf %259 : vector<2x64xf32>
    %261 = math.exp %260 : vector<2x64xf32>
    %cst_69 = arith.constant 1.000000e+00 : f32
    %262 = vector.broadcast %cst_69 : f32 to vector<2x64xf32>
    %263 = arith.addf %262, %261 : vector<2x64xf32>
    %264 = arith.divf %262, %263 : vector<2x64xf32>
    %265 = vector.extract_strided_slice %252 {offsets = [0, 128], sizes = [2, 64], strides = [1, 1]} : vector<2x256xf32> to vector<2x64xf32>
    %266 = math.tanh %265 : vector<2x64xf32>
    %267 = vector.extract_strided_slice %252 {offsets = [0, 192], sizes = [2, 64], strides = [1, 1]} : vector<2x256xf32> to vector<2x64xf32>
    %268 = arith.negf %267 : vector<2x64xf32>
    %269 = math.exp %268 : vector<2x64xf32>
    %cst_70 = arith.constant 1.000000e+00 : f32
    %270 = vector.broadcast %cst_70 : f32 to vector<2x64xf32>
    %271 = arith.addf %270, %269 : vector<2x64xf32>
    %272 = arith.divf %270, %271 : vector<2x64xf32>
    %273 = arith.mulf %264, %234 : vector<2x64xf32>
    %274 = arith.mulf %258, %266 : vector<2x64xf32>
    %275 = arith.addf %273, %274 : vector<2x64xf32>
    %276 = math.tanh %275 : vector<2x64xf32>
    %277 = arith.mulf %272, %276 : vector<2x64xf32>
    %278 = vector.extract_strided_slice %277 {offsets = [0, 0], sizes = [2, 32], strides = [1, 1]} : vector<2x64xf32> to vector<2x32xf32>
    %279 = arith.index_cast %c6_i32 : i32 to index
    %c0_71 = arith.constant 0 : index
    %c0_72 = arith.constant 0 : index
    %280 = vector.load %arg2[%279, %c0_71, %c0_72] : memref<8x2x64xf32, #tpu.memory_space<vmem>>, vector<1x2x32xf32>
    %281 = vector.shape_cast %280 : vector<1x2x32xf32> to vector<2x32xf32>
    %282 = vector.shape_cast %278 : vector<2x32xf32> to vector<1x2x32xf32>
    tpu.vector_store %arg2[%279, %c0_71, %c0_72], %282 {strides = array<i32>} : memref<8x2x64xf32, #tpu.memory_space<vmem>>, vector<1x2x32xf32>,
    %283 = vector.extract_strided_slice %277 {offsets = [0, 32], sizes = [2, 32], strides = [1, 1]} : vector<2x64xf32> to vector<2x32xf32>
    %c7_i32_73 = arith.constant 7 : i32
    %284 = arith.subi %c7_i32_73, %c6_i32 : i32
    %285 = arith.index_cast %284 : i32 to index
    %c0_74 = arith.constant 0 : index
    %c32_75 = arith.constant 32 : index
    %286 = vector.load %arg2[%285, %c0_74, %c32_75] : memref<8x2x64xf32, #tpu.memory_space<vmem>>, vector<1x2x32xf32>
    %287 = vector.shape_cast %286 : vector<1x2x32xf32> to vector<2x32xf32>
    %288 = vector.shape_cast %283 : vector<2x32xf32> to vector<1x2x32xf32>
    tpu.vector_store %arg2[%285, %c0_74, %c32_75], %288 {strides = array<i32>} : memref<8x2x64xf32, #tpu.memory_space<vmem>>, vector<1x2x32xf32>,
    %c7_i32_76 = arith.constant 7 : i32
    %289 = arith.index_cast %c7_i32_76 : i32 to index
    %c0_77 = arith.constant 0 : index
    %c0_78 = arith.constant 0 : index
    %290 = vector.load %arg0[%289, %c0_77, %c0_78] : memref<8x2x256xf32, #tpu.memory_space<vmem>>, vector<1x2x256xf32>
    %291 = vector.shape_cast %290 : vector<1x2x256xf32> to vector<2x256xf32>
    %cst_79 = arith.constant dense<0.000000e+00> : vector<2x256xf32>
    %292 = tpu.matmul %277, %0, %cst_79 {dimension_numbers = #tpu.dot_dimension_numbers<[1], [0], [0], [1], [0, 0, 1, 1], [], []>} : vector<2x64xf32>, vector<64x256xf32>, vector<2x256xf32> -> vector<2x256xf32>
    %293 = arith.addf %291, %292 : vector<2x256xf32>
    %294 = vector.extract_strided_slice %293 {offsets = [0, 0], sizes = [2, 64], strides = [1, 1]} : vector<2x256xf32> to vector<2x64xf32>
    %295 = arith.negf %294 : vector<2x64xf32>
    %296 = math.exp %295 : vector<2x64xf32>
    %cst_80 = arith.constant 1.000000e+00 : f32
    %297 = vector.broadcast %cst_80 : f32 to vector<2x64xf32>
    %298 = arith.addf %297, %296 : vector<2x64xf32>
    %299 = arith.divf %297, %298 : vector<2x64xf32>
    %300 = vector.extract_strided_slice %293 {offsets = [0, 64], sizes = [2, 64], strides = [1, 1]} : vector<2x256xf32> to vector<2x64xf32>
    %301 = arith.negf %300 : vector<2x64xf32>
    %302 = math.exp %301 : vector<2x64xf32>
    %cst_81 = arith.constant 1.000000e+00 : f32
    %303 = vector.broadcast %cst_81 : f32 to vector<2x64xf32>
    %304 = arith.addf %303, %302 : vector<2x64xf32>
    %305 = arith.divf %303, %304 : vector<2x64xf32>
    %306 = vector.extract_strided_slice %293 {offsets = [0, 128], sizes = [2, 64], strides = [1, 1]} : vector<2x256xf32> to vector<2x64xf32>
    %307 = math.tanh %306 : vector<2x64xf32>
    %308 = vector.extract_strided_slice %293 {offsets = [0, 192], sizes = [2, 64], strides = [1, 1]} : vector<2x256xf32> to vector<2x64xf32>
    %309 = arith.negf %308 : vector<2x64xf32>
    %310 = math.exp %309 : vector<2x64xf32>
    %cst_82 = arith.constant 1.000000e+00 : f32
    %311 = vector.broadcast %cst_82 : f32 to vector<2x64xf32>
    %312 = arith.addf %311, %310 : vector<2x64xf32>
    %313 = arith.divf %311, %312 : vector<2x64xf32>
    %314 = arith.mulf %305, %275 : vector<2x64xf32>
    %315 = arith.mulf %299, %307 : vector<2x64xf32>
    %316 = arith.addf %314, %315 : vector<2x64xf32>
    %317 = math.tanh %316 : vector<2x64xf32>
    %318 = arith.mulf %313, %317 : vector<2x64xf32>
    %319 = vector.extract_strided_slice %318 {offsets = [0, 0], sizes = [2, 32], strides = [1, 1]} : vector<2x64xf32> to vector<2x32xf32>
    %320 = arith.index_cast %c7_i32_76 : i32 to index
    %c0_83 = arith.constant 0 : index
    %c0_84 = arith.constant 0 : index
    %321 = vector.load %arg2[%320, %c0_83, %c0_84] : memref<8x2x64xf32, #tpu.memory_space<vmem>>, vector<1x2x32xf32>
    %322 = vector.shape_cast %321 : vector<1x2x32xf32> to vector<2x32xf32>
    %323 = vector.shape_cast %319 : vector<2x32xf32> to vector<1x2x32xf32>
    tpu.vector_store %arg2[%320, %c0_83, %c0_84], %323 {strides = array<i32>} : memref<8x2x64xf32, #tpu.memory_space<vmem>>, vector<1x2x32xf32>,
    %324 = vector.extract_strided_slice %318 {offsets = [0, 32], sizes = [2, 32], strides = [1, 1]} : vector<2x64xf32> to vector<2x32xf32>
    %c7_i32_85 = arith.constant 7 : i32
    %325 = arith.subi %c7_i32_85, %c7_i32_76 : i32
    %326 = arith.index_cast %325 : i32 to index
    %c0_86 = arith.constant 0 : index
    %c32_87 = arith.constant 32 : index
    %327 = vector.load %arg2[%326, %c0_86, %c32_87] : memref<8x2x64xf32, #tpu.memory_space<vmem>>, vector<1x2x32xf32>
    %328 = vector.shape_cast %327 : vector<1x2x32xf32> to vector<2x32xf32>
    %329 = vector.shape_cast %324 : vector<2x32xf32> to vector<1x2x32xf32>
    tpu.vector_store %arg2[%326, %c0_86, %c32_87], %329 {strides = array<i32>} : memref<8x2x64xf32, #tpu.memory_space<vmem>>, vector<1x2x32xf32>,
    %c8_i32 = arith.constant 8 : i32
    return
  }
}

</mosaic_0001>

<bundles_post_ra>
// kernel: tpu_custom_call.1
= control target key start
LH: loop header
LB: loop body
LE: loop exit
PB: predicated region body
PF: predicated region fallthrough
CT: control target
= control target key end

     0   :  { %7 = vsyncpa [#allocation3], 0  ;;  %s1607_s0 = inlined_call_operand.hbm [shape: f32[8,2,256], index: 0, kind: input, shape index: {}]   ;;  %s1608_s1 = inlined_call_operand.hbm [shape: f32[64,256], index: 1, kind: input, shape index: {}]   ;;  %s1609_s2 = inlined_call_operand.hbm [shape: f32[8,2,64], index: 2, kind: output, shape index: {}]  }
   0x1   :  { %8 = vsyncpa [#allocation6], 0 }
   0x2   :  { %9 = vsyncpa [#allocation4], 0  ;;  %s1397_s9 = smov [#allocation2]   ;;  %s1325_s13 = scalar_lea.hbm %s1607_s0, 512 }
   0x3   :  { %s15_s10 = sshll.u32 %s1397_s9, 4  ;;  %p1326_p0 = scmp.ne.s32.totalorder %s1607_s0, %s1325_s13  ;;  %s16_s10 = int_to_ptr.vmem [resolvable:$true] %s15_s10 }
   0x4   :  { %p1329_p1 = scmp.lt.u32.totalorder %s1325_s13, %s1607_s0 }
   0x6   :  { %p1331_p2 = pnand %p1329_p1, %p1326_p0 }
   0x8   :  { %1334 = shalt.err (!%p1331_p2)
}
   0x9   :  { %s1335_s18 = scalar_lea.vmem %s16_s10, 512  ;;  %p1340_p4 = scmp.lt.s32.totalorder %s16_s10, %s16_s10 }
   0xa   :  { %p1336_p3 = scmp.ne.s32.totalorder %s16_s10, %s1335_s18  ;;  %p1341_p5 = scmp.lt.s32.totalorder %s1335_s18, %s1335_s18 }
   0xc   :  { %p1342_p6 = por %p1341_p5, %p1340_p4 }
   0xe   :  { %p1343_p7 = pnand %p1342_p6, %p1336_p3 }
  0x10   :  { %1346 = shalt.err (!%p1343_p7)
}
  0x11   :  { %s1398_s19 = smov 64   ;;  %s1399_s20 = smov 4  }
  0x12   :  { %21 = dma.hbm_to_vmem [thread:$0]  %s1607_s0, 512, %s16_s10, [#allocation3], %s1398_s19, %s1398_s19, %s1399_s20  }
  0x13   :  { %s1400_s23 = smov [#allocation5]   ;;  %s1347_s27 = scalar_lea.hbm %s1608_s1, 2048 }
  0x14   :  { %s27_s24 = sshll.u32 %s1400_s23, 4  ;;  %p1348_p8 = scmp.ne.s32.totalorder %s1608_s1, %s1347_s27  ;;  %s28_s24 = int_to_ptr.vmem [resolvable:$true] %s27_s24 }
  0x15   :  { %p1351_p9 = scmp.lt.u32.totalorder %s1347_s27, %s1608_s1 }
  0x17   :  { %p1353_p10 = pnand %p1351_p9, %p1348_p8 }
  0x19   :  { %1356 = shalt.err (!%p1353_p10)
}
  0x1a   :  { %s1357_s4 = scalar_lea.vmem %s28_s24, 2048  ;;  %p1362_p12 = scmp.lt.s32.totalorder %s28_s24, %s28_s24 }
  0x1b   :  { %p1358_p11 = scmp.ne.s32.totalorder %s28_s24, %s1357_s4  ;;  %p1363_p13 = scmp.lt.s32.totalorder %s1357_s4, %s1357_s4 }
  0x1d   :  { %p1364_p0 = por %p1363_p13, %p1362_p12 }
  0x1f   :  { %p1365_p1 = pnand %p1364_p0, %p1358_p11 }
  0x21   :  { %1368 = shalt.err (!%p1365_p1)
}
  0x22   :  { %s1401_s0 = smov 256   ;;  %s1402_s5 = smov 16  }
  0x23   :  { %33 = dma.hbm_to_vmem [thread:$0]  %s1608_s1, 2048, %s28_s24, [#allocation6], %s1401_s0, %s1401_s0, %s1402_s5  }
  0x24   :  { %1391 = dma.done.wait [#allocation3], 512  }
  0x25   :  { %1392 = vsyncadd [#allocation3], 4294966784 }
  0x26   :  { %1393 = dma.done.wait [#allocation6], 2048  }
  0x27   :  { %1394 = vsyncadd [#allocation6], 4294965248  ;;  %v1403_v0 = vmov 0.0   ;;  %v41_v1 = vld [vmem:[#allocation5 + $0x8] sm:$0xff]  ;;  %v43_v2 = vld [vmem:[#allocation5 + $0x18] sm:$0xff]  ;;  %v138_v27 = vlaneseq  ;;  %vm177_vm0 = vcmask 254976  }
  0x28   :  { %125 = vmatprep.mubr.f32.mxu0 %v1403_v0  ;;  %251 = vmatprep.mubr.f32.mxu1 %v1403_v0  ;;  %v40_v3 = vld [vmem:[#allocation5] sm:$0xff]  ;;  %v1451_v4 = vpack.c.bf16 %v43_v2, %v41_v1  ;;  %v42_v5 = vld [vmem:[#allocation5 + $0x10] sm:$0xff]  ;;  %v45_v6 = vld [vmem:[#allocation5 + $0x28] sm:$0xff]  ;;  %v1404_v25 = vmov 1983009808   ;;  %vm180_vm1 = vcmask 517376  }
  0x29   :  { %v47_v7 = vld [vmem:[#allocation5 + $0x38] sm:$0xff]  ;;  %v1453_v8 = vpack.c.bf16 %v42_v5, %v40_v3  ;;  %v44_v10 = vld [vmem:[#allocation5 + $0x20] sm:$0xff]  ;;  %v46_v11 = vld [vmem:[#allocation5 + $0x30] sm:$0xff]  ;;  %v136_v26 = vunpack.c.l.s4 %v1404_v25  ;;  %v139_v29 = vshrl.u32 %v138_v27, 7  ;;  %vm57_vm2 = vcmask 523264   ;;  %s1405_s1 = smov [#allocation7]  }
  0x2a   :  { %v1455_v9 = vpack.c.bf16 %v47_v7, %v45_v6  ;;  %v49_v12 = vld [vmem:[#allocation5 + $0x48] sm:$0xff]  ;;  %1091 = vmatprep.subr.bf16.mxu0 %v1451_v4  ;;  %v51_v13 = vld [vmem:[#allocation5 + $0x58] sm:$0xff]  ;;  %1107 = vmatprep.subr.bf16.mxu1 %v1451_v4  ;;  %v1460_v14 = vpack.c.bf16 %v46_v11, %v44_v10  ;;  %v48_v16 = vld [vmem:[#allocation5 + $0x40] sm:$0xff]  ;;  %s1054_s8 = sshll.u32 %s1405_s1, 4  ;;  %s1055_s8 = int_to_ptr.vmem [resolvable:$true] %s1054_s8 }
  0x2b   :  { %1093 = vmatpush1.bf16.msra.mxu0 %v1453_v8  ;;  %1109 = vmatpush1.bf16.msra.mxu1 %v1453_v8  ;;  %v1464_v15 = vpack.c.bf16 %v51_v13, %v49_v12  ;;  %v50_v17 = vld [vmem:[#allocation5 + $0x50] sm:$0xff]  ;;  %v53_v18 = vld [vmem:[#allocation5 + $0x68] sm:$0xff]  ;;  %v55_v19 = vld [vmem:[#allocation5 + $0x78] sm:$0xff]  ;;  %v137_v28 = vunpack.c.0.s8 %v136_v26  ;;  %s1369_s9 = scalar_lea.vmem %s1055_s8, 256  ;;  %p1374_p3 = scmp.lt.s32.totalorder %s1055_s8, %s1055_s8 }
  0x2c   :  { %1095 = vmatprep.subr.bf16.mxu0 %v1455_v9  ;;  %1111 = vmatprep.subr.bf16.mxu1 %v1455_v9  ;;  %v1468_v20 = vpack.c.bf16 %v50_v17, %v48_v16  ;;  %v1472_v21 = vpack.c.bf16 %v55_v19, %v53_v18  ;;  %v52_v22 = vld [vmem:[#allocation5 + $0x60] sm:$0xff]  ;;  %v54_v23 = vld [vmem:[#allocation5 + $0x70] sm:$0xff]  ;;  %p1370_p2 = scmp.ne.s32.totalorder %s1055_s8, %s1369_s9  ;;  %p1375_p4 = scmp.lt.s32.totalorder %s1369_s9, %s1369_s9 }
  0x2d   :  { %v1476_v24 = vpack.c.bf16 %v54_v23, %v52_v22  ;;  %v1495_v31 = vsub.s32 %v137_v28, %v139_v29  ;;  %v56_v34 = vld [vmem:[#allocation2] sm:$0xf]  ;;  %v183_v59 = vld [vmem:[#allocation2 + $0x4] sm:$0xf]  ;;  %v308_v29 = vld [vmem:[#allocation2 + $0x8] sm:$0xf] }
  0x2e   :  { %p1376_p5 = por %p1375_p4, %p1374_p3 }
  0x2f   :  { %1097 = vmatpush1.bf16.msra.mxu0 %v1460_v14  ;;  %1113 = vmatpush1.bf16.msra.mxu1 %v1460_v14 }
  0x30   :  { %1099 = vmatprep.subr.bf16.mxu0 %v1464_v15  ;;  %1115 = vmatprep.subr.bf16.mxu1 %v1464_v15  ;;  %p1377_p6 = pnand %p1376_p5, %p1370_p2 }
  0x33   :  { %1101 = vmatpush1.bf16.msra.mxu0 %v1468_v20  ;;  %1117 = vmatpush1.bf16.msra.mxu1 %v1468_v20 }
  0x34   :  { %1103 = vmatprep.subr.bf16.mxu0 %v1472_v21  ;;  %1119 = vmatprep.subr.bf16.mxu1 %v1472_v21 }
  0x37   :  { %1105 = vmatpush1.bf16.msra.mxu0 %v1476_v24  ;;  %1121 = vmatpush1.bf16.msra.mxu1 %v1476_v24 }
  0x38   :  { %1123 = vmatprep.subr.bf16.mxu0 %v1451_v4  ;;  %1139 = vmatprep.subr.bf16.mxu1 %v1451_v4 }
  0x3a   :  { %126 = vmatmul.mubr.f32.vlgmr.msra.gmra.mrb[0].mxu0 %v1403_v0 }
  0x3b   :  { %1125 = vmatpush1.bf16.msra.mxu0 %v1453_v8  ;;  %376 = vmatprep.mubr.f32.mxu0 %v1403_v0 }
  0x3c   :  { %1127 = vmatprep.subr.bf16.mxu0 %v1455_v9 }
  0x3f   :  { %1129 = vmatpush1.bf16.msra.mxu0 %v1460_v14 }
  0x40   :  { %1131 = vmatprep.subr.bf16.mxu0 %v1464_v15 }
  0x43   :  { %1133 = vmatpush1.bf16.msra.mxu0 %v1468_v20 }
  0x44   :  { %1135 = vmatprep.subr.bf16.mxu0 %v1472_v21 }
  0x47   :  { %1137 = vmatpush1.bf16.msra.mxu0 %v1476_v24 }
  0x48   :  { %1155 = vmatprep.subr.bf16.mxu0 %v1451_v4 }
 0x10d   :  { %v127_v30 = vpop.f32.mrb[0].mxu0 }
 0x10e   :  { %v129_v32 = vpop.f32.mrb[1].mxu0 }
 0x10f   :  { %v134_v33 = vcombine.low %v127_v30, %v129_v32 }
 0x111   :  { %v141_v35 = vrot.slane %v134_v33, %v1495_v31 }
 0x113   :  { %v143_v36 = vadd.f32 %v141_v35, %v56_v34 }
 0x115   :  { %v1067_v37 = vmul.f32 -1.442695, %v143_v36  ;;  %v151_v38 = vrot.slane %v143_v36, 2 }
 0x117   :  { %1229 = vpow2.f32 %v1067_v37 }
 0x118   :  { %1231 = vtanh.f32 %v151_v38 }
 0x121   :  { %v1230_v39 = vpop.eup %1229 }
 0x122   :  { %v147_v40 = vadd.f32 1.0, %v1230_v39  ;;  %v1232_v41 = vpop.eup %1231 }
 0x124   :  { %1233 = vrcp.f32 %v147_v40 }
 0x12e   :  { %v1234_v42 = vpop.eup %1233 }
 0x12f   :  { %v165_v43 = vmul.f32 %v1234_v42, %v1232_v41  ;;  %v164_v44 = vmul.f32 0.0, %v1234_v42 }
 0x131   :  { %167 = vrot.lane.b32.xlu0 %v165_v43, %s1398_s19 }
 0x135   :  { %154 = vrot.lane.b32.xlu0 %v143_v36, %s1398_s19 }
 0x1a3   :  { %v168_v45 = vpop.permute.xlu0 %167 }
 0x1a4   :  { %v170_v46 = vadd.f32 %v168_v45, %v164_v44 }
 0x1a6   :  { %1235 = vtanh.f32 %v170_v46 }
 0x1a7   :  { %v155_v48 = vpop.permute.xlu0 %154 }
 0x1a8   :  { %v156_v49 = vrot.slane %v155_v48, 2 }
 0x1aa   :  { %v1068_v50 = vmul.f32 -1.442695, %v156_v49 }
 0x1ac   :  { %1237 = vpow2.f32 %v1068_v50 }
 0x1b0   :  { %v1236_v47 = vpop.eup %1235 }
 0x1b1   :  { %173 = vrot.lane.b32.xlu1 %v1236_v47, %s1398_s19 }
 0x1b6   :  { %v1238_v51 = vpop.eup %1237 }
 0x1b7   :  { %v161_v52 = vadd.f32 1.0, %v1238_v51 }
 0x1b9   :  { %1239 = vrcp.f32 %v161_v52 }
 0x1c3   :  { %v1240_v53 = vpop.eup %1239 }
 0x223   :  { %v174_v54 = vpop.permute.xlu1 %173 }
 0x224   :  { %v176_v55 = vmul.f32 %v1240_v53, %v174_v54 }
 0x226   :  { %178 = vst.msk [vmem:[#allocation7] sm:$0x3] %vm177_vm0, %v176_v55  ;;  %1069 = vmatmul.mubr.msk.f32.vlgmr.msra.gmra.mrb[0].mxu1 %vm57_vm2, %v176_v55 }
 0x227   :  { %181 = vst.msk [vmem:[#allocation7 + $0xe] sm:$0x3] %vm180_vm1, %v176_v55  ;;  %1141 = vmatpush1.bf16.msra.mxu1 %v1453_v8  ;;  %501 = vmatprep.mubr.f32.mxu1 %v1403_v0  ;;  %v433_v55 = vld [vmem:[#allocation2 + $0xc] sm:$0xf] }
 0x228   :  { %1143 = vmatprep.subr.bf16.mxu1 %v1455_v9 }
 0x22b   :  { %1145 = vmatpush1.bf16.msra.mxu1 %v1460_v14 }
 0x22c   :  { %1147 = vmatprep.subr.bf16.mxu1 %v1464_v15 }
 0x22f   :  { %1149 = vmatpush1.bf16.msra.mxu1 %v1468_v20 }
 0x230   :  { %1151 = vmatprep.subr.bf16.mxu1 %v1472_v21 }
 0x233   :  { %1153 = vmatpush1.bf16.msra.mxu1 %v1476_v24 }
 0x234   :  { %1171 = vmatprep.subr.bf16.mxu1 %v1451_v4 }
 0x2f9   :  { %v253_v56 = vpop.f32.mrb[0].mxu1 }
 0x2fa   :  { %v255_v57 = vpop.f32.mrb[1].mxu1 }
 0x2fb   :  { %v260_v58 = vcombine.low %v253_v56, %v255_v57 }
 0x2fd   :  { %v267_v60 = vrot.slane %v260_v58, %v1495_v31 }
 0x2ff   :  { %v269_v61 = vadd.f32 %v267_v60, %v183_v59 }
 0x301   :  { %280 = vrot.lane.b32.xlu0 %v269_v61, %s1398_s19  ;;  %v1070_v62 = vmul.f32 -1.442695, %v269_v61  ;;  %v277_v63 = vrot.slane %v269_v61, 2 }
 0x303   :  { %1241 = vpow2.f32 %v1070_v62 }
 0x304   :  { %1243 = vtanh.f32 %v277_v63 }
 0x30d   :  { %v1242_v1 = vpop.eup %1241 }
 0x30e   :  { %v273_v2 = vadd.f32 1.0, %v1242_v1  ;;  %v1244_v3 = vpop.eup %1243 }
 0x310   :  { %1245 = vrcp.f32 %v273_v2 }
 0x31a   :  { %v1246_v5 = vpop.eup %1245 }
 0x31b   :  { %v291_v6 = vmul.f32 %v1246_v5, %v1244_v3  ;;  %v290_v7 = vmul.f32 %v1246_v5, %v170_v46 }
 0x31d   :  { %293 = vrot.lane.b32.xlu1 %v291_v6, %s1398_s19 }
 0x373   :  { %v281_v13 = vpop.permute.xlu0 %280 }
 0x374   :  { %v282_v16 = vrot.slane %v281_v13, 2 }
 0x376   :  { %v1071_v17 = vmul.f32 -1.442695, %v282_v16 }
 0x38f   :  { %v294_v10 = vpop.permute.xlu1 %293 }
 0x390   :  { %v296_v11 = vadd.f32 %v294_v10, %v290_v7 }
 0x392   :  { %1247 = vtanh.f32 %v296_v11 }
 0x393   :  { %1249 = vpow2.f32 %v1071_v17 }
 0x39c   :  { %v1248_v12 = vpop.eup %1247 }
 0x39d   :  { %299 = vrot.lane.b32.xlu1 %v1248_v12, %s1398_s19  ;;  %v1250_v18 = vpop.eup %1249 }
 0x39e   :  { %v287_v19 = vadd.f32 1.0, %v1250_v18 }
 0x3a0   :  { %1251 = vrcp.f32 %v287_v19 }
 0x3aa   :  { %v1252_v22 = vpop.eup %1251 }
 0x40f   :  { %v300_v23 = vpop.permute.xlu1 %299 }
 0x410   :  { %v302_v25 = vmul.f32 %v1252_v22, %v300_v23  ;;  %v558_v23 = vld [vmem:[#allocation2 + $0x10] sm:$0xf] }
 0x412   :  { %304 = vst.msk [vmem:[#allocation7 + $0x2] sm:$0x3] %vm177_vm0, %v302_v25  ;;  %1072 = vmatmul.mubr.msk.f32.vlgmr.msra.gmra.mrb[2].mxu0 %vm57_vm2, %v302_v25 }
 0x413   :  { %306 = vst.msk [vmem:[#allocation7 + $0xc] sm:$0x3] %vm180_vm1, %v302_v25  ;;  %1157 = vmatpush1.bf16.msra.mxu0 %v1453_v8  ;;  %626 = vmatprep.mubr.f32.mxu0 %v1403_v0 }
 0x414   :  { %1159 = vmatprep.subr.bf16.mxu0 %v1455_v9 }
 0x417   :  { %1161 = vmatpush1.bf16.msra.mxu0 %v1460_v14 }
 0x418   :  { %1163 = vmatprep.subr.bf16.mxu0 %v1464_v15 }
 0x41b   :  { %1165 = vmatpush1.bf16.msra.mxu0 %v1468_v20 }
 0x41c   :  { %1167 = vmatprep.subr.bf16.mxu0 %v1472_v21 }
 0x41f   :  { %1169 = vmatpush1.bf16.msra.mxu0 %v1476_v24 }
 0x420   :  { %1187 = vmatprep.subr.bf16.mxu0 %v1451_v4 }
 0x4e5   :  { %v378_v26 = vpop.f32.mrb[2].mxu0 }
 0x4e6   :  { %v380_v27 = vpop.f32.mrb[3].mxu0 }
 0x4e7   :  { %v385_v28 = vcombine.low %v378_v26, %v380_v27 }
 0x4e9   :  { %v392_v30 = vrot.slane %v385_v28, %v1495_v31 }
 0x4eb   :  { %v394_v32 = vadd.f32 %v392_v30, %v308_v29 }
 0x4ed   :  { %405 = vrot.lane.b32.xlu1 %v394_v32, %s1398_s19  ;;  %v1073_v33 = vmul.f32 -1.442695, %v394_v32  ;;  %v402_v34 = vrot.slane %v394_v32, 2 }
 0x4ef   :  { %1253 = vpow2.f32 %v1073_v33 }
 0x4f0   :  { %1255 = vtanh.f32 %v402_v34 }
 0x4f9   :  { %v1254_v35 = vpop.eup %1253 }
 0x4fa   :  { %v398_v36 = vadd.f32 1.0, %v1254_v35  ;;  %v1256_v37 = vpop.eup %1255 }
 0x4fc   :  { %1257 = vrcp.f32 %v398_v36 }
 0x506   :  { %v1258_v38 = vpop.eup %1257 }
 0x507   :  { %v416_v39 = vmul.f32 %v1258_v38, %v1256_v37  ;;  %v415_v40 = vmul.f32 %v1258_v38, %v296_v11 }
 0x509   :  { %418 = vrot.lane.b32.xlu0 %v416_v39, %s1398_s19 }
 0x55f   :  { %v406_v44 = vpop.permute.xlu1 %405 }
 0x560   :  { %v407_v45 = vrot.slane %v406_v44, 2 }
 0x562   :  { %v1074_v46 = vmul.f32 -1.442695, %v407_v45 }
 0x57b   :  { %v419_v41 = vpop.permute.xlu0 %418 }
 0x57c   :  { %v421_v42 = vadd.f32 %v419_v41, %v415_v40 }
 0x57e   :  { %1259 = vtanh.f32 %v421_v42 }
 0x57f   :  { %1261 = vpow2.f32 %v1074_v46 }
 0x588   :  { %v1260_v43 = vpop.eup %1259 }
 0x589   :  { %424 = vrot.lane.b32.xlu0 %v1260_v43, %s1398_s19  ;;  %v1262_v47 = vpop.eup %1261 }
 0x58a   :  { %v412_v48 = vadd.f32 1.0, %v1262_v47 }
 0x58c   :  { %1263 = vrcp.f32 %v412_v48 }
 0x596   :  { %v1264_v49 = vpop.eup %1263 }
 0x5fb   :  { %v425_v50 = vpop.permute.xlu0 %424 }
 0x5fc   :  { %v427_v51 = vmul.f32 %v1264_v49, %v425_v50  ;;  %v681_v50 = vld [vmem:[#allocation2 + $0x14] sm:$0xf] }
 0x5fe   :  { %429 = vst.msk [vmem:[#allocation7 + $0x4] sm:$0x3] %vm177_vm0, %v427_v51  ;;  %1075 = vmatmul.mubr.msk.f32.vlgmr.msra.gmra.mrb[2].mxu1 %vm57_vm2, %v427_v51 }
 0x5ff   :  { %431 = vst.msk [vmem:[#allocation7 + $0xa] sm:$0x3] %vm180_vm1, %v427_v51  ;;  %1173 = vmatpush1.bf16.msra.mxu1 %v1453_v8  ;;  %749 = vmatprep.mubr.f32.mxu1 %v1403_v0 }
 0x600   :  { %1175 = vmatprep.subr.bf16.mxu1 %v1455_v9 }
 0x603   :  { %1177 = vmatpush1.bf16.msra.mxu1 %v1460_v14 }
 0x604   :  { %1179 = vmatprep.subr.bf16.mxu1 %v1464_v15 }
 0x607   :  { %1181 = vmatpush1.bf16.msra.mxu1 %v1468_v20 }
 0x608   :  { %1183 = vmatprep.subr.bf16.mxu1 %v1472_v21 }
 0x60b   :  { %1185 = vmatpush1.bf16.msra.mxu1 %v1476_v24 }
 0x60c   :  { %1203 = vmatprep.subr.bf16.mxu1 %v1451_v4 }
 0x6d1   :  { %v503_v52 = vpop.f32.mrb[2].mxu1 }
 0x6d2   :  { %v505_v53 = vpop.f32.mrb[3].mxu1 }
 0x6d3   :  { %v510_v54 = vcombine.low %v503_v52, %v505_v53 }
 0x6d5   :  { %v517_v56 = vrot.slane %v510_v54, %v1495_v31 }
 0x6d7   :  { %v519_v57 = vadd.f32 %v517_v56, %v433_v55 }
 0x6d9   :  { %530 = vrot.lane.b32.xlu0 %v519_v57, %s1398_s19  ;;  %v1076_v58 = vmul.f32 -1.442695, %v519_v57  ;;  %v527_v59 = vrot.slane %v519_v57, 2 }
 0x6db   :  { %1265 = vpow2.f32 %v1076_v58 }
 0x6dc   :  { %1267 = vtanh.f32 %v527_v59 }
 0x6e5   :  { %v1266_v60 = vpop.eup %1265 }
 0x6e6   :  { %v523_v61 = vadd.f32 1.0, %v1266_v60  ;;  %v1268_v62 = vpop.eup %1267 }
 0x6e8   :  { %1269 = vrcp.f32 %v523_v61 }
 0x6f2   :  { %v1270_v63 = vpop.eup %1269 }
 0x6f3   :  { %v541_v1 = vmul.f32 %v1270_v63, %v1268_v62  ;;  %v540_v4 = vmul.f32 %v1270_v63, %v421_v42 }
 0x6f5   :  { %543 = vrot.lane.b32.xlu1 %v541_v1, %s1398_s19 }
 0x74b   :  { %v531_v6 = vpop.permute.xlu0 %530 }
 0x74c   :  { %v532_v7 = vrot.slane %v531_v6, 2 }
 0x74e   :  { %v1077_v10 = vmul.f32 -1.442695, %v532_v7 }
 0x767   :  { %v544_v2 = vpop.permute.xlu1 %543 }
 0x768   :  { %v546_v3 = vadd.f32 %v544_v2, %v540_v4 }
 0x76a   :  { %1271 = vtanh.f32 %v546_v3 }
 0x76b   :  { %1273 = vpow2.f32 %v1077_v10 }
 0x774   :  { %v1272_v5 = vpop.eup %1271 }
 0x775   :  { %549 = vrot.lane.b32.xlu1 %v1272_v5, %s1398_s19  ;;  %v1274_v11 = vpop.eup %1273 }
 0x776   :  { %v537_v12 = vadd.f32 1.0, %v1274_v11 }
 0x778   :  { %1275 = vrcp.f32 %v537_v12 }
 0x782   :  { %v1276_v13 = vpop.eup %1275 }
 0x7e7   :  { %v550_v16 = vpop.permute.xlu1 %549 }
 0x7e8   :  { %v552_v17 = vmul.f32 %v1276_v13, %v550_v16 }
 0x7ea   :  { %554 = vst.msk [vmem:[#allocation7 + $0x6] sm:$0x3] %vm177_vm0, %v552_v17  ;;  %1078 = vmatmul.mubr.msk.f32.vlgmr.msra.gmra.mrb[4].mxu0 %vm57_vm2, %v552_v17 }
 0x7eb   :  { %556 = vst.msk [vmem:[#allocation7 + $0x8] sm:$0x3] %vm180_vm1, %v552_v17  ;;  %1189 = vmatpush1.bf16.msra.mxu0 %v1453_v8  ;;  %872 = vmatprep.mubr.f32.mxu0 %v1403_v0 }
 0x7ec   :  { %1191 = vmatprep.subr.bf16.mxu0 %v1455_v9 }
 0x7ef   :  { %1193 = vmatpush1.bf16.msra.mxu0 %v1460_v14 }
 0x7f0   :  { %1195 = vmatprep.subr.bf16.mxu0 %v1464_v15 }
 0x7f3   :  { %1197 = vmatpush1.bf16.msra.mxu0 %v1468_v20 }
 0x7f4   :  { %1199 = vmatprep.subr.bf16.mxu0 %v1472_v21 }
 0x7f7   :  { %1201 = vmatpush1.bf16.msra.mxu0 %v1476_v24 }
 0x8bd   :  { %v628_v18 = vpop.f32.mrb[4].mxu0 }
 0x8be   :  { %v630_v19 = vpop.f32.mrb[5].mxu0 }
 0x8bf   :  { %v635_v22 = vcombine.low %v628_v18, %v630_v19 }
 0x8c1   :  { %v642_v25 = vrot.slane %v635_v22, %v1495_v31 }
 0x8c3   :  { %v644_v26 = vadd.f32 %v642_v25, %v558_v23 }
 0x8c5   :  { %655 = vrot.lane.b32.xlu1 %v644_v26, %s1398_s19  ;;  %v1079_v27 = vmul.f32 -1.442695, %v644_v26  ;;  %v652_v28 = vrot.slane %v644_v26, 2 }
 0x8c7   :  { %1277 = vpow2.f32 %v1079_v27 }
 0x8c8   :  { %1279 = vtanh.f32 %v652_v28 }
 0x8d1   :  { %v1278_v29 = vpop.eup %1277 }
 0x8d2   :  { %v648_v30 = vadd.f32 1.0, %v1278_v29  ;;  %v1280_v32 = vpop.eup %1279 }
 0x8d4   :  { %1281 = vrcp.f32 %v648_v30 }
 0x8de   :  { %v1282_v33 = vpop.eup %1281 }
 0x8df   :  { %v666_v34 = vmul.f32 %v1282_v33, %v1280_v32  ;;  %v665_v35 = vmul.f32 %v1282_v33, %v546_v3  ;;  %v804_v3 = vld [vmem:[#allocation2 + $0x18] sm:$0xf] }
 0x8e1   :  { %668 = vrot.lane.b32.xlu0 %v666_v34, %s1398_s19 }
 0x937   :  { %v656_v39 = vpop.permute.xlu1 %655 }
 0x938   :  { %v657_v40 = vrot.slane %v656_v39, 2 }
 0x93a   :  { %v1080_v41 = vmul.f32 -1.442695, %v657_v40 }
 0x953   :  { %v669_v36 = vpop.permute.xlu0 %668 }
 0x954   :  { %v671_v37 = vadd.f32 %v669_v36, %v665_v35 }
 0x956   :  { %1283 = vtanh.f32 %v671_v37 }
 0x957   :  { %1285 = vpow2.f32 %v1080_v41 }
 0x960   :  { %v1284_v38 = vpop.eup %1283 }
 0x961   :  { %674 = vrot.lane.b32.xlu0 %v1284_v38, %s1398_s19  ;;  %v1286_v42 = vpop.eup %1285 }
 0x962   :  { %v662_v43 = vadd.f32 1.0, %v1286_v42 }
 0x964   :  { %1287 = vrcp.f32 %v662_v43 }
 0x96e   :  { %v1288_v44 = vpop.eup %1287 }
 0x9d3   :  { %v675_v45 = vpop.permute.xlu0 %674 }
 0x9d4   :  { %v677_v46 = vmul.f32 %v1288_v44, %v675_v45 }
 0x9d6   :  { %678 = vst.msk [vmem:[#allocation7 + $0x8] sm:$0x3] %vm177_vm0, %v677_v46  ;;  %1081 = vmatmul.mubr.msk.f32.vlgmr.msra.gmra.mrb[4].mxu1 %vm57_vm2, %v677_v46 }
 0x9d7   :  { %679 = vst.msk [vmem:[#allocation7 + $0x6] sm:$0x3] %vm180_vm1, %v677_v46  ;;  %1205 = vmatpush1.bf16.msra.mxu1 %v1453_v8  ;;  %995 = vmatprep.mubr.f32.mxu1 %v1403_v0 }
 0x9d8   :  { %1207 = vmatprep.subr.bf16.mxu1 %v1455_v9 }
 0x9db   :  { %1209 = vmatpush1.bf16.msra.mxu1 %v1460_v14 }
 0x9dc   :  { %1211 = vmatprep.subr.bf16.mxu1 %v1464_v15 }
 0x9df   :  { %1213 = vmatpush1.bf16.msra.mxu1 %v1468_v20 }
 0x9e0   :  { %1215 = vmatprep.subr.bf16.mxu1 %v1472_v21 }
 0x9e3   :  { %1217 = vmatpush1.bf16.msra.mxu1 %v1476_v24 }
 0xaa9   :  { %v751_v47 = vpop.f32.mrb[4].mxu1 }
 0xaaa   :  { %v753_v48 = vpop.f32.mrb[5].mxu1 }
 0xaab   :  { %v758_v49 = vcombine.low %v751_v47, %v753_v48 }
 0xaad   :  { %v765_v8 = vrot.slane %v758_v49, %v1495_v31 }
 0xaaf   :  { %v767_v51 = vadd.f32 %v765_v8, %v681_v50 }
 0xab1   :  { %778 = vrot.lane.b32.xlu0 %v767_v51, %s1398_s19  ;;  %v1082_v0 = vmul.f32 -1.442695, %v767_v51  ;;  %v775_v9 = vrot.slane %v767_v51, 2 }
 0xab3   :  { %1289 = vpow2.f32 %v1082_v0 }
 0xab4   :  { %1291 = vtanh.f32 %v775_v9 }
 0xabd   :  { %v1290_v14 = vpop.eup %1289 }
 0xabe   :  { %v771_v15 = vadd.f32 1.0, %v1290_v14  ;;  %v1292_v20 = vpop.eup %1291 }
 0xac0   :  { %1293 = vrcp.f32 %v771_v15 }
 0xaca   :  { %v1294_v21 = vpop.eup %1293 }
 0xacb   :  { %v789_v52 = vmul.f32 %v1294_v21, %v1292_v20  ;;  %v788_v24 = vmul.f32 %v1294_v21, %v671_v37  ;;  %v927_v37 = vld [vmem:[#allocation2 + $0x1c] sm:$0xf] }
 0xacd   :  { %791 = vrot.lane.b32.xlu1 %v789_v52, %s1398_s19 }
 0xb23   :  { %v779_v56 = vpop.permute.xlu0 %778 }
 0xb24   :  { %v780_v57 = vrot.slane %v779_v56, 2 }
 0xb26   :  { %v1083_v58 = vmul.f32 -1.442695, %v780_v57 }
 0xb3f   :  { %v792_v53 = vpop.permute.xlu1 %791 }
 0xb40   :  { %v794_v54 = vadd.f32 %v792_v53, %v788_v24 }
 0xb42   :  { %1295 = vtanh.f32 %v794_v54 }
 0xb43   :  { %1297 = vpow2.f32 %v1083_v58 }
 0xb4c   :  { %v1296_v55 = vpop.eup %1295 }
 0xb4d   :  { %797 = vrot.lane.b32.xlu1 %v1296_v55, %s1398_s19  ;;  %v1298_v59 = vpop.eup %1297 }
 0xb4e   :  { %v785_v60 = vadd.f32 1.0, %v1298_v59 }
 0xb50   :  { %1299 = vrcp.f32 %v785_v60 }
 0xb5a   :  { %v1300_v61 = vpop.eup %1299 }
 0xbbf   :  { %v798_v62 = vpop.permute.xlu1 %797 }
 0xbc0   :  { %v800_v63 = vmul.f32 %v1300_v61, %v798_v62 }
 0xbc2   :  { %801 = vst.msk [vmem:[#allocation7 + $0xa] sm:$0x3] %vm177_vm0, %v800_v63  ;;  %1084 = vmatmul.mubr.msk.f32.vlgmr.msra.gmra.mrb[6].mxu0 %vm57_vm2, %v800_v63 }
 0xbc3   :  { %802 = vst.msk [vmem:[#allocation7 + $0x4] sm:$0x3] %vm180_vm1, %v800_v63 }
 0xc95   :  { %v874_v1 = vpop.f32.mrb[6].mxu0 }
 0xc96   :  { %v876_v4 = vpop.f32.mrb[7].mxu0 }
 0xc97   :  { %v881_v2 = vcombine.low %v874_v1, %v876_v4 }
 0xc99   :  { %v888_v5 = vrot.slane %v881_v2, %v1495_v31 }
 0xc9b   :  { %v890_v6 = vadd.f32 %v888_v5, %v804_v3 }
 0xc9d   :  { %901 = vrot.lane.b32.xlu1 %v890_v6, %s1398_s19  ;;  %v1085_v7 = vmul.f32 -1.442695, %v890_v6  ;;  %v898_v10 = vrot.slane %v890_v6, 2 }
 0xc9f   :  { %1301 = vpow2.f32 %v1085_v7 }
 0xca0   :  { %1303 = vtanh.f32 %v898_v10 }
 0xca9   :  { %v1302_v11 = vpop.eup %1301 }
 0xcaa   :  { %v894_v12 = vadd.f32 1.0, %v1302_v11  ;;  %v1304_v13 = vpop.eup %1303 }
 0xcac   :  { %1305 = vrcp.f32 %v894_v12 }
 0xcb6   :  { %v1306_v16 = vpop.eup %1305 }
 0xcb7   :  { %v912_v17 = vmul.f32 %v1306_v16, %v1304_v13  ;;  %v911_v18 = vmul.f32 %v1306_v16, %v794_v54 }
 0xcb9   :  { %914 = vrot.lane.b32.xlu0 %v912_v17, %s1398_s19 }
 0xd0f   :  { %v902_v25 = vpop.permute.xlu1 %901 }
 0xd10   :  { %v903_v26 = vrot.slane %v902_v25, 2 }
 0xd12   :  { %v1086_v27 = vmul.f32 -1.442695, %v903_v26 }
 0xd2b   :  { %v915_v19 = vpop.permute.xlu0 %914 }
 0xd2c   :  { %v917_v22 = vadd.f32 %v915_v19, %v911_v18 }
 0xd2e   :  { %1307 = vtanh.f32 %v917_v22 }
 0xd2f   :  { %1309 = vpow2.f32 %v1086_v27 }
 0xd38   :  { %v1308_v23 = vpop.eup %1307 }
 0xd39   :  { %920 = vrot.lane.b32.xlu0 %v1308_v23, %s1398_s19  ;;  %v1310_v28 = vpop.eup %1309 }
 0xd3a   :  { %v908_v29 = vadd.f32 1.0, %v1310_v28 }
 0xd3c   :  { %1311 = vrcp.f32 %v908_v29 }
 0xd46   :  { %v1312_v30 = vpop.eup %1311 }
 0xdab   :  { %v921_v32 = vpop.permute.xlu0 %920 }
 0xdac   :  { %v923_v33 = vmul.f32 %v1312_v30, %v921_v32 }
 0xdae   :  { %924 = vst.msk [vmem:[#allocation7 + $0xc] sm:$0x3] %vm177_vm0, %v923_v33  ;;  %1087 = vmatmul.mubr.msk.f32.vlgmr.msra.gmra.mrb[6].mxu1 %vm57_vm2, %v923_v33 }
 0xdaf   :  { %925 = vst.msk [vmem:[#allocation7 + $0x2] sm:$0x3] %vm180_vm1, %v923_v33 }
 0xe81   :  { %v997_v34 = vpop.f32.mrb[6].mxu1 }
 0xe82   :  { %v999_v35 = vpop.f32.mrb[7].mxu1 }
 0xe83   :  { %v1004_v36 = vcombine.low %v997_v34, %v999_v35 }
 0xe85   :  { %v1011_v38 = vrot.slane %v1004_v36, %v1495_v31 }
 0xe87   :  { %v1013_v39 = vadd.f32 %v1011_v38, %v927_v37 }
 0xe89   :  { %1024 = vrot.lane.b32.xlu0 %v1013_v39, %s1398_s19  ;;  %v1088_v40 = vmul.f32 -1.442695, %v1013_v39  ;;  %v1021_v41 = vrot.slane %v1013_v39, 2 }
 0xe8b   :  { %1313 = vpow2.f32 %v1088_v40 }
 0xe8c   :  { %1315 = vtanh.f32 %v1021_v41 }
 0xe95   :  { %v1314_v42 = vpop.eup %1313 }
 0xe96   :  { %v1017_v43 = vadd.f32 1.0, %v1314_v42  ;;  %v1316_v44 = vpop.eup %1315 }
 0xe98   :  { %1317 = vrcp.f32 %v1017_v43 }
 0xea2   :  { %v1318_v45 = vpop.eup %1317 }
 0xea3   :  { %v1035_v46 = vmul.f32 %v1318_v45, %v1316_v44  ;;  %v1034_v47 = vmul.f32 %v1318_v45, %v917_v22 }
 0xea5   :  { %1037 = vrot.lane.b32.xlu1 %v1035_v46, %s1398_s19 }
 0xefb   :  { %v1025_v50 = vpop.permute.xlu0 %1024 }
 0xefc   :  { %v1026_v8 = vrot.slane %v1025_v50, 2 }
 0xefe   :  { %v1089_v51 = vmul.f32 -1.442695, %v1026_v8 }
 0xf17   :  { %v1038_v48 = vpop.permute.xlu1 %1037 }
 0xf18   :  { %v1040_v49 = vadd.f32 %v1038_v48, %v1034_v47 }
 0xf1a   :  { %1319 = vtanh.f32 %v1040_v49 }
 0xf1b   :  { %1321 = vpow2.f32 %v1089_v51 }
 0xf24   :  { %v1320_v31 = vpop.eup %1319 }
 0xf25   :  { %1043 = vrot.lane.b32.xlu1 %v1320_v31, %s1398_s19  ;;  %v1322_v0 = vpop.eup %1321 }
 0xf26   :  { %v1031_v9 = vadd.f32 1.0, %v1322_v0 }
 0xf28   :  { %1323 = vrcp.f32 %v1031_v9 }
 0xf32   :  { %v1324_v14 = vpop.eup %1323 }
 0xf97   :  { %v1044_v15 = vpop.permute.xlu1 %1043 }
 0xf98   :  { %v1046_v20 = vmul.f32 %v1324_v14, %v1044_v15 }
 0xf9a   :  { %1047 = vst.msk [vmem:[#allocation7 + $0xe] sm:$0x3] %vm177_vm0, %v1046_v20 }
 0xf9b   :  { %1048 = vst.msk [vmem:[#allocation7] sm:$0x3] %vm180_vm1, %v1046_v20 }
 0xf9c   :  { %1380 = shalt.err (!%p1377_p6)
}
 0xf9d   :  { %s1381_s12 = scalar_lea.hbm %s1609_s2, 256 }
 0xf9e   :  { %p1382_p7 = scmp.ne.s32.totalorder %s1609_s2, %s1381_s12  ;;  %p1385_p8 = scmp.lt.u32.totalorder %s1381_s12, %s1609_s2 }
 0xfa0   :  { %p1387_p9 = pnand %p1385_p8, %p1382_p7 }
 0xfa2   :  { %1390 = shalt.err (!%p1387_p9)
}
 0xfa3   :  { %s1406_s17 = smov 32   ;;  %s1407_s18 = smov 2  }
 0xfa4   :  { %1060 = dma.vmem_to_hbm [thread:$0]  %s1055_s8, 256, %s1609_s2, [#allocation4], %s1406_s17, %s1406_s17, %s1407_s18  }
 0xfa5   :  { %1395 = dma.done.wait [#allocation4], 256  }
 0xfa6   :  { %1396 = vsyncadd [#allocation4], 4294967040 }
 0xfa7   :  { %1064 = vsyncpa [#allocation3], 1 }
 0xfa8   :  { %1065 = vsyncpa [#allocation6], 1 }
 0xfa9   :  { %1066 = vsyncpa [#allocation4], 1 }

</bundles_post_ra>
